<compile_context>
chip_gen: v7x
topology: tpu7x:2x2x1
jax: 0.10.0
libtpu: 0.0.40
codegen_flags: <defaults>
</compile_context>

<pallas_src>
import jax
import jax.numpy as jnp
from jax import lax
from jax.experimental import pallas as pl
from jax.experimental.pallas import tpu as pltpu


def _round_up(v, m):
    return ((v + m - 1) // m) * m


def _make_kernel(confidence, smoothing, n_true, tile_n, n_inner, num_classes):
    inv_c = 1.0 / float(num_classes)
    confidence = float(confidence)
    smoothing = float(smoothing)

    def kernel(x_ref, t_ref, out_ref, acc_ref):
        p = pl.program_id(0)          # chunk axis ("parallel"; megacore on v7x)
        k = pl.program_id(1)          # serial reduction over batch tiles

        @pl.when(k == 0)
        def _init():
            acc_ref[...] = jnp.zeros_like(acc_ref)

        x = x_ref[...]                # (tile_n, C), input dtype (f32 or bf16)
        t = t_ref[...]                # (tile_n, 1) int32

        # Gather x[row, target[row]] (iota compare + select, no one-hot matmul)
        # and the plain row-sum: stay in the input dtype, accumulate in f32.
        col = lax.broadcasted_iota(jnp.int32, x.shape, 1)
        x_t = jnp.sum(jnp.where(col == t, x, jnp.zeros_like(x)),
                      axis=-1, keepdims=True, dtype=jnp.float32)
        sum_x = jnp.sum(x, axis=-1, keepdims=True, dtype=jnp.float32)

        # Numerically stable log-sum-exp per row in f32; logprobs are never
        # materialized as a (tile_n, C) array.
        xf = x.astype(jnp.float32)
        m = jnp.max(xf, axis=-1, keepdims=True)
        lse = jnp.log(jnp.sum(jnp.exp(xf - m), axis=-1, keepdims=True))
        log_z = m + lse                                          # (tile_n, 1)

        nll_loss = log_z - x_t                                   # -logprob[target]
        smooth_loss = log_z - sum_x * inv_c                      # -mean(logprob)
        loss = confidence * nll_loss + smoothing * smooth_loss   # (tile_n, 1)

        # Mask rows past the true batch size (partial last tile and clamped
        # phantom steps).  Select (not multiply) so garbage/NaN rows are safe.
        row0 = (p * n_inner + k) * tile_n
        rows = row0 + lax.broadcasted_iota(jnp.int32, (tile_n, 1), 0)
        loss = jnp.where(rows < n_true, loss, 0.0)

        # One scalar partial sum per step, broadcast-accumulated into a single
        # (8,128) vreg — one unmasked load+store, no 1-lane-wide RMW.
        acc_ref[...] = acc_ref[...] + jnp.sum(loss)

        @pl.when(k == n_inner - 1)
        def _finalize():
            out_ref[...] = acc_ref[...].reshape(out_ref.shape)

    return kernel


def label_smoothing_loss(x, target, smoothing=0.1, tile_n=None):
    """x: (N, C) float logits (f32 or bf16); target: (N,) int class ids.

    Returns the scalar f32 smoothed NLL loss (mean over the batch).
    """
    N, C = x.shape
    confidence = 1.0 - smoothing
    itemsize = jnp.dtype(x.dtype).itemsize

    # ---- generation-aware VMEM budget --------------------------------------
    try:
        vmem_cap = int(pltpu.get_tpu_info().vmem_capacity_bytes)
    except Exception:
        vmem_cap = 64 * 1024 * 1024            # conservative (v7x per-TC VMEM)
    vmem_limit = max(32 << 20, min((vmem_cap * 3) // 4, 96 << 20))

    # ---- tile selection: biggest row tile that fits the budget -------------
    # Per block row: double-buffered input block + ~3 live f32 temporaries
    # inside the kernel (upcast, exp result, gather/select result).
    if tile_n is None:
        per_row_bytes = C * (2 * itemsize + 3 * 4)
        block_budget = max(2 << 20, vmem_limit - (8 << 20))
        tile_n = block_budget // per_row_bytes
    tile_n = int(tile_n)
    if N <= 8:
        tile_n = N                              # single full-extent block
    else:
        tile_n = max(8, min((tile_n // 8) * 8, (N // 8) * 8))

    n_tiles = pl.cdiv(N, tile_n)

    # Two chunks only on dual-TensorCore chips (v7x); one stream otherwise.
    try:
        kind = jax.devices()[0].device_kind.lower()
    except Exception:
        kind = ""
    num_par = 2 if ("v7" in kind and n_tiles >= 2) else 1
    n_inner = pl.cdiv(n_tiles, num_par)

    target2d = target.astype(jnp.int32).reshape(N, 1)

    kernel = _make_kernel(confidence, smoothing, N, tile_n, n_inner, C)

    # No padding of x: any grid step whose linear tile index exceeds the last
    # real tile is clamped to it (its rows are >= N and fully masked in-kernel).
    def _blk(p, k):
        return (jnp.minimum(p * n_inner + k, n_tiles - 1), 0)

    partials = pl.pallas_call(
        kernel,
        out_shape=jax.ShapeDtypeStruct((num_par, 8, 128), jnp.float32),
        grid_spec=pltpu.PrefetchScalarGridSpec(
            num_scalar_prefetch=0,
            grid=(num_par, n_inner),
            in_specs=[
                pl.BlockSpec((tile_n, C), _blk),
                pl.BlockSpec((tile_n, 1), _blk),
            ],
            out_specs=pl.BlockSpec((1, 8, 128), lambda p, k: (p, 0, 0)),
            scratch_shapes=[pltpu.VMEM((8, 128), jnp.float32)],
        ),
        compiler_params=pltpu.CompilerParams(
            dimension_semantics=("parallel", "arbitrary"),
            vmem_limit_bytes=int(vmem_limit),
        ),
    )(x, target2d)

    # Per-chunk partial sums -> mean over the TRUE batch size.
    return jnp.sum(partials[:, 0, 0]) / N


def _reference_loss(x, target, smoothing=0.1):
    confidence = 1.0 - smoothing
    logprobs = jax.nn.log_softmax(x.astype(jnp.float32), axis=-1)
    nll = -jnp.take_along_axis(
        logprobs, target.astype(jnp.int32)[:, None], axis=-1)[:, 0]
    smooth = -jnp.mean(logprobs, axis=-1)
    return jnp.mean(confidence * nll + smoothing * smooth)


if __name__ == "__main__":
    smoothing = 0.1
    key = jax.random.PRNGKey(0)
    kx, kt = jax.random.split(key)

    # Case 1: f32 logits, small forced tile -> multi-tile reduction, a partial
    # last tile, in-kernel row masking, and (on v7x) the 2-chunk split.
    N1, C1 = 50, 128
    x1 = jax.random.normal(kx, (N1, C1), dtype=jnp.float32)
    t1 = jax.random.randint(kt, (N1,), 0, C1, dtype=jnp.int32)
    out1 = jax.block_until_ready(
        label_smoothing_loss(x1, t1, smoothing=smoothing, tile_n=16))
    ref1 = _reference_loss(x1, t1, smoothing=smoothing)
    assert jnp.allclose(out1, ref1, rtol=1e-5, atol=1e-5), (out1, ref1)

    # Case 2: bf16 logits (half the HBM traffic), automatic tile selection.
    N2, C2 = 64, 128
    x2 = jax.random.normal(jax.random.PRNGKey(1), (N2, C2),
                           dtype=jnp.float32).astype(jnp.bfloat16)
    t2 = jax.random.randint(jax.random.PRNGKey(2), (N2,), 0, C2, dtype=jnp.int32)
    out2 = jax.block_until_ready(
        label_smoothing_loss(x2, t2, smoothing=smoothing))
    ref2 = _reference_loss(x2.astype(jnp.float32), t2, smoothing=smoothing)
    assert jnp.allclose(out2, ref2, rtol=1e-3, atol=1e-3), (out2, ref2)

    print("KERNEL_OK")
</pallas_src>

<mosaic_0001>
module attributes {stable_mosaic.version = 11 : i64} {
  func.func @kernel(%arg0: i32, %arg1: i32, %arg2: memref<16x128xf32, #tpu.memory_space<vmem>>, %arg3: memref<16x1xi32, #tpu.memory_space<vmem>>, %arg4: memref<1x8x128xf32, #tpu.memory_space<vmem>>, %arg5: memref<8x128xf32, #tpu.memory_space<vmem>>) attributes {dimension_semantics = [#tpu.dimension_semantics<parallel>, #tpu.dimension_semantics<arbitrary>], iteration_bounds = array<i64: 1, 4>, scalar_prefetch = 0 : i64, scratch_operands = 1 : i64, tpu.core_type = #tpu.core_type<tc>, window_params = [{transform_indices = @transform_0, window_bounds = array<i64: 16, 128>}, {transform_indices = @transform_1, window_bounds = array<i64: 16, 1>}, {transform_indices = @transform_2, window_bounds = array<i64: 1, 8, 128>}]} {
    %c0_i32 = arith.constant 0 : i32
    %0 = arith.cmpi eq, %arg1, %c0_i32 : i32
    %1 = arith.extui %0 : i1 to i32
    %c0_i32_0 = arith.constant 0 : i32
    %2 = arith.cmpi ne, %1, %c0_i32_0 : i32
    scf.if %2 {
      %cst_18 = arith.constant 0.000000e+00 : f32
      %53 = vector.broadcast %cst_18 : f32 to vector<8x128xf32>
      %c0_19 = arith.constant 0 : index
      %c0_20 = arith.constant 0 : index
      %54 = vector.load %arg5[%c0_19, %c0_20] : memref<8x128xf32, #tpu.memory_space<vmem>>, vector<8x128xf32>
      tpu.vector_store %arg5[%c0_19, %c0_20], %53 {strides = array<i32>} : memref<8x128xf32, #tpu.memory_space<vmem>>, vector<8x128xf32>,
    } else {
    }
    %c0 = arith.constant 0 : index
    %c0_1 = arith.constant 0 : index
    %3 = vector.load %arg2[%c0, %c0_1] : memref<16x128xf32, #tpu.memory_space<vmem>>, vector<16x128xf32>
    %c0_2 = arith.constant 0 : index
    %c0_3 = arith.constant 0 : index
    %4 = vector.load %arg3[%c0_2, %c0_3] : memref<16x1xi32, #tpu.memory_space<vmem>>, vector<16x1xi32>
    %5 = tpu.iota {dimensions = array<i32: 1>} : vector<16x128xi32>
    %6 = vector.broadcast %4 : vector<16x1xi32> to vector<16x128xi32>
    %7 = arith.cmpi eq, %5, %6 : vector<16x128xi32>
    %cst = arith.constant 0.000000e+00 : f32
    %8 = vector.broadcast %cst : f32 to vector<16x128xf32>
    %9 = arith.select %7, %3, %8 : vector<16x128xi1>, vector<16x128xf32>
    %cst_4 = arith.constant dense<0.000000e+00> : vector<16xf32>
    %10 = vector.multi_reduction <add>, %9, %cst_4 [1] : vector<16x128xf32> to vector<16xf32>
    %11 = vector.shape_cast %10 : vector<16xf32> to vector<16x1xf32>
    %cst_5 = arith.constant dense<0.000000e+00> : vector<16xf32>
    %12 = vector.multi_reduction <add>, %3, %cst_5 [1] : vector<16x128xf32> to vector<16xf32>
    %13 = vector.shape_cast %12 : vector<16xf32> to vector<16x1xf32>
    %cst_6 = arith.constant dense<0xFF800000> : vector<16xf32>
    %14 = vector.multi_reduction <maximumf>, %3, %cst_6 [1] : vector<16x128xf32> to vector<16xf32>
    %15 = vector.shape_cast %14 : vector<16xf32> to vector<16x1xf32>
    %16 = vector.broadcast %15 : vector<16x1xf32> to vector<16x128xf32>
    %17 = arith.subf %3, %16 : vector<16x128xf32>
    %18 = math.exp %17 : vector<16x128xf32>
    %cst_7 = arith.constant dense<0.000000e+00> : vector<16xf32>
    %19 = vector.multi_reduction <add>, %18, %cst_7 [1] : vector<16x128xf32> to vector<16xf32>
    %20 = vector.shape_cast %19 : vector<16xf32> to vector<16x1xf32>
    %21 = math.log %20 : vector<16x1xf32>
    %22 = arith.addf %15, %21 : vector<16x1xf32>
    %23 = arith.subf %22, %11 : vector<16x1xf32>
    %cst_8 = arith.constant 7.812500e-03 : f32
    %24 = vector.broadcast %cst_8 : f32 to vector<16x1xf32>
    %25 = arith.mulf %13, %24 : vector<16x1xf32>
    %26 = arith.subf %22, %25 : vector<16x1xf32>
    %cst_9 = arith.constant 0.899999976 : f32
    %27 = vector.broadcast %cst_9 : f32 to vector<16x1xf32>
    %28 = arith.mulf %27, %23 : vector<16x1xf32>
    %cst_10 = arith.constant 1.000000e-01 : f32
    %29 = vector.broadcast %cst_10 : f32 to vector<16x1xf32>
    %30 = arith.mulf %29, %26 : vector<16x1xf32>
    %31 = arith.addf %28, %30 : vector<16x1xf32>
    %c4_i32 = arith.constant 4 : i32
    %32 = arith.muli %arg0, %c4_i32 : i32
    %33 = arith.addi %32, %arg1 : i32
    %c16_i32 = arith.constant 16 : i32
    %34 = arith.muli %33, %c16_i32 : i32
    %35 = tpu.iota {dimensions = array<i32: 0>} : vector<16x1xi32>
    %36 = vector.broadcast %34 : i32 to vector<16x1xi32>
    %37 = arith.addi %36, %35 : vector<16x1xi32>
    %c50_i32 = arith.constant 50 : i32
    %38 = vector.broadcast %c50_i32 : i32 to vector<16x1xi32>
    %39 = arith.cmpi slt, %37, %38 : vector<16x1xi32>
    %cst_11 = arith.constant 0.000000e+00 : f32
    %40 = vector.broadcast %cst_11 : f32 to vector<16x1xf32>
    %41 = arith.select %39, %31, %40 : vector<16x1xi1>, vector<16x1xf32>
    %c0_12 = arith.constant 0 : index
    %c0_13 = arith.constant 0 : index
    %42 = vector.load %arg5[%c0_12, %c0_13] : memref<8x128xf32, #tpu.memory_space<vmem>>, vector<8x128xf32>
    %43 = vector.shape_cast %41 : vector<16x1xf32> to vector<1x16x1xf32>
    %cst_14 = arith.constant dense<0.000000e+00> : vector<1xf32>
    %44 = vector.multi_reduction <add>, %43, %cst_14 [1, 2] : vector<1x16x1xf32> to vector<1xf32>
    %45 = vector.shape_cast %44 : vector<1xf32> to vector<1x1x1xf32>
    %46 = vector.extract %45[0, 0, 0] : f32 from vector<1x1x1xf32>
    %47 = vector.broadcast %46 : f32 to vector<8x128xf32>
    %48 = arith.addf %42, %47 : vector<8x128xf32>
    %c0_15 = arith.constant 0 : index
    %c0_16 = arith.constant 0 : index
    %49 = vector.load %arg5[%c0_15, %c0_16] : memref<8x128xf32, #tpu.memory_space<vmem>>, vector<8x128xf32>
    tpu.vector_store %arg5[%c0_15, %c0_16], %48 {strides = array<i32>} : memref<8x128xf32, #tpu.memory_space<vmem>>, vector<8x128xf32>,
    %c3_i32 = arith.constant 3 : i32
    %50 = arith.cmpi eq, %arg1, %c3_i32 : i32
    %51 = arith.extui %50 : i1 to i32
    %c0_i32_17 = arith.constant 0 : i32
    %52 = arith.cmpi ne, %51, %c0_i32_17 : i32
    scf.if %52 {
      %c0_18 = arith.constant 0 : index
      %c0_19 = arith.constant 0 : index
      %53 = vector.load %arg5[%c0_18, %c0_19] : memref<8x128xf32, #tpu.memory_space<vmem>>, vector<8x128xf32>
      %54 = vector.shape_cast %53 : vector<8x128xf32> to vector<1x8x128xf32>
      %c0_20 = arith.constant 0 : index
      %c0_21 = arith.constant 0 : index
      %c0_22 = arith.constant 0 : index
      %55 = vector.load %arg4[%c0_20, %c0_21, %c0_22] : memref<1x8x128xf32, #tpu.memory_space<vmem>>, vector<1x8x128xf32>
      tpu.vector_store %arg4[%c0_20, %c0_21, %c0_22], %54 {strides = array<i32>} : memref<1x8x128xf32, #tpu.memory_space<vmem>>, vector<1x8x128xf32>,
    } else {
    }
    return
  }
  func.func @transform_0(%arg0: i32, %arg1: i32) -> (i32, i32) {
    %c4_i32 = arith.constant 4 : i32
    %0 = arith.muli %arg0, %c4_i32 : i32
    %1 = arith.addi %0, %arg1 : i32
    %c3_i32 = arith.constant 3 : i32
    %2 = arith.minsi %1, %c3_i32 : i32
    %c0_i32 = arith.constant 0 : i32
    %c0_i32_0 = arith.constant 0 : i32
    return %2, %c0_i32 : i32, i32
  }
  func.func @transform_1(%arg0: i32, %arg1: i32) -> (i32, i32) {
    %c4_i32 = arith.constant 4 : i32
    %0 = arith.muli %arg0, %c4_i32 : i32
    %1 = arith.addi %0, %arg1 : i32
    %c3_i32 = arith.constant 3 : i32
    %2 = arith.minsi %1, %c3_i32 : i32
    %c0_i32 = arith.constant 0 : i32
    %c0_i32_0 = arith.constant 0 : i32
    return %2, %c0_i32 : i32, i32
  }
  func.func @transform_2(%arg0: i32, %arg1: i32) -> (i32, i32, i32) {
    %c0_i32 = arith.constant 0 : i32
    %c0_i32_0 = arith.constant 0 : i32
    %c0_i32_1 = arith.constant 0 : i32
    return %arg0, %c0_i32, %c0_i32_0 : i32, i32, i32
  }
}

</mosaic_0001>

<bundles_post_ra>
// kernel: tpu_custom_call.1
= control target key start
LH: loop header
LB: loop body
LE: loop exit
PB: predicated region body
PF: predicated region fallthrough
CT: control target
= control target key end

     0   :  { %7 = vsyncpa [#allocation4], 0  ;;  %s567_s9 = smov 0   ;;  %s569_s10 = smov 0   ;;  %s636_s0 = inlined_call_operand.vmem [shape: f32[50,128], index: 0, kind: input, shape index: {}]   ;;  %s637_s1 = inlined_call_operand.vmem [shape: s32[50,1], index: 1, kind: input, shape index: {}]   ;;  %s638_s2 = inlined_call_operand.hbm [shape: f32[1,8,128], index: 2, kind: output, shape index: {}]  }
   0x1   :  { %s571_s11 = smov 0  }
   0x2 LB: > { %s435_s12 = sadd.s32 4294967295, %s547_s11   ;;  %s22_s13 = sadd.s32 1, %s543_s10  ;;  %s547_s11 = sphi %s571_s11, %s13_s11   ;;  %s543_s10 = sphi %s569_s10, %s641_s10   ;;  %s539_s9 = sphi %s567_s9, %s640_s9  }
   0x3   : > { %p23_p0 = scmp.ge.s32.totalorder %s22_s13, 4  ;;  %p438_p1 = scmp.ge.s32.totalorder %s547_s11, 1 }
   0x4   : > { %p185_p2 = scmp.lt.s32.totalorder %s547_s11, 5 }
   0x5   : > { %s643_s13 = smov (%p23_p0, %s22_s13), 0 }
   0x6   : > { %p186_p3 = pnand %p438_p1, %p185_p2 }
   0x7   : > { %p225_p4 = scmp.lt.s32.totalorder (!%p186_p3), %s539_s9, 3  ;;  %p443_p6 = scmp.ne.s32.totalorder (!%p186_p3), %s539_s9, 0 }
   0x8   : > { %189 = sbr.rel (%p186_p3) target bundleno = 593 (0x251), region = 28 }
   0xf   : > { %s226_s14 = scalar_select %p225_p4, %s539_s9, 3 }
  0x10   : > { %270 = sbr.rel (%p443_p6) target bundleno = 23 (0x17), region = 32  ;;  %v549_v0 = vmov (!%p443_p6), 0.0  }
  0x11   : > { %s439_s15 = sshll.u32 %s226_s14, 1  ;;  %271 = vst [vmem:[#allocation2] sm:$0xff] (!%p443_p6), %v549_v0 }
  0x12   : > { %p232_p5 = scmp.lt.s32.totalorder %s439_s15, 6 }
  0x14   : > { %s645_s15 = smov (!%p232_p5, %s439_s15), 6 }
  0x15   : > { %s440_s16 = sshll.u32 %s645_s15, 3 }
  0x16   : > { %s235_s19 = scalar_lea.vmem %s636_s0, %s440_s16  ;;  %s257_s22 = scalar_lea.vmem %s637_s1, %s440_s16 }
  0x17 PF: > { %v272_v1 = vld [vmem:[%s235_s19] sm:$0xff]  ;;  %v550_v3 = vmov 0   ;;  %v273_v4 = vld [vmem:[%s235_s19 + $0x8] sm:$0xff]  ;;  %v276_v12 = vlaneseq  ;;  %s444_s23 = sshll.u32 %s539_s9, 4  ;;  %vm342_vm4 = vcmask 7168   ;;  %p445_p7 = scmp.ne.s32.totalorder %s539_s9, 3 }
  0x18   : > { %v274_v2 = vld [vmem:[%s257_s22] sm:$0xff]  ;;  %296 = vmax.xlane.f32.xlu0 %v272_v1  ;;  %485 = vset.pattern.permute.xlu1 %v550_v3  ;;  %v275_v5 = vld [vmem:[%s257_s22 + $0x8] sm:$0xff]  ;;  %v334_v30 = vstv %s444_s23 }
  0x19   : > { %279 = vperm.xlu1 %485, %v274_v2   ;;  %486 = vset.pattern.permute.xlu0 %v550_v3  ;;  %v277_v15 = vand.u32 127, %v276_v12  ;;  %v332_v26 = vshrl.u32 %v276_v12, 7  ;;  %v341_v61 = vld [vmem:[#allocation2] sm:$0xff] }
  0x1b   : > { %v333_v32 = vadd.s32 8, %v332_v26  ;;  %v335_v36 = vadd.s32 %v334_v30, %v332_v26 }
  0x1c   : > { %298 = vmax.xlane.f32.xlu0 %v273_v4 }
  0x1d   : > { %282 = vperm.xlu1 %485, %v275_v5   ;;  %v336_v42 = vadd.s32 %v334_v30, %v333_v32  ;;  %vm337_vm2 = vcmp.lt.s32.totalorder %v335_v36, 50 }
  0x1f   : > { %vm338_vm3 = vcmp.lt.s32.totalorder %v336_v42, 50 }
  0x98   : > { %v280_v14 = vpop.permute.xlu1 %279 }
  0x99   : > { %vm284_vm0 = vcmp.eq.s32.totalorder %v277_v15, %v280_v14 }
  0x9a   : > { %v286_v18 = vsel %vm284_vm0, %v272_v1, 0.0 }
  0x9c   : > { %v283_v17 = vpop.permute.xlu1 %282 }
  0x9d   : > { %vm285_vm1 = vcmp.eq.s32.totalorder %v277_v15, %v283_v17 }
  0x9e   : > { %v287_v19 = vsel %vm285_vm1, %v273_v4, 0.0 }
  0xa5   : > { %v297_v6 = vpop.xlane.xlu0 %296 }
  0xa6   : > { %v300_v7 = vsub.f32 %v272_v1, %v297_v6 }
  0xa8   : > { %v302_v8 = vmul.f32 1.442695, %v300_v7 }
  0xa9   : > { %v299_v9 = vpop.xlane.xlu0 %298 }
  0xaa   : > { %487 = vpow2.f32 %v302_v8  ;;  %v301_v10 = vsub.f32 %v273_v4, %v299_v9 }
  0xac   : > { %v304_v11 = vmul.f32 1.442695, %v301_v10 }
  0xae   : > { %489 = vpow2.f32 %v304_v11 }
  0xb4   : > { %v488_v13 = vpop.eup %487 }
  0xb5   : > { %306 = vadd.xlane.f32.xlu0 %v488_v13 }
  0xb8   : > { %v490_v16 = vpop.eup %489 }
  0xb9   : > { %292 = vadd.xlane.f32.xlu0 %v272_v1  ;;  %308 = vadd.xlane.f32.xlu1 %v490_v16 }
  0xbd   : > { %294 = vadd.xlane.f32.xlu0 %v273_v4 }
  0xc1   : > { %288 = vadd.xlane.f32.xlu0 %v286_v18 }
  0xc5   : > { %290 = vadd.xlane.f32.xlu0 %v287_v19 }
 0x142   : > { %v307_v20 = vpop.xlane.xlu0 %306 }
 0x143   : > { %491 = vlog2.f32 %v307_v20 }
 0x146   : > { %v309_v21 = vpop.xlane.xlu1 %308  ;;  %v293_v22 = vpop.xlane.xlu0 %292 }
 0x147   : > { %493 = vlog2.f32 %v309_v21  ;;  %v318_v29 = vmul.f32 0.0078125, %v293_v22 }
 0x14a   : > { %v295_v23 = vpop.xlane.xlu0 %294 }
 0x14b   : > { %v319_v39 = vmul.f32 0.0078125, %v295_v23 }
 0x14d   : > { %v492_v24 = vpop.eup %491 }
 0x14e   : > { %v311_v25 = vmul.f32 0.6931472, %v492_v24  ;;  %v289_v27 = vpop.xlane.xlu0 %288 }
 0x150   : > { %v314_v28 = vadd.f32 %v311_v25, %v297_v6 }
 0x151   : > { %v494_v31 = vpop.eup %493 }
 0x152   : > { %v313_v33 = vmul.f32 0.6931472, %v494_v31  ;;  %v320_v34 = vsub.f32 %v314_v28, %v318_v29  ;;  %v316_v35 = vsub.f32 %v314_v28, %v289_v27  ;;  %v291_v41 = vpop.xlane.xlu0 %290 }
 0x154   : > { %v324_v37 = vmul.f32 0.1, %v320_v34  ;;  %v315_v38 = vadd.f32 %v313_v33, %v299_v9  ;;  %v322_v40 = vmul.f32 0.9, %v316_v35 }
 0x156   : > { %v321_v43 = vsub.f32 %v315_v38, %v319_v39  ;;  %v326_v44 = vadd.f32 %v324_v37, %v322_v40  ;;  %v317_v45 = vsub.f32 %v315_v38, %v291_v41 }
 0x158   : > { %v325_v46 = vmul.f32 0.1, %v321_v43  ;;  %v323_v47 = vmul.f32 0.9, %v317_v45  ;;  %v339_v49 = vsel %vm337_vm2, %v326_v44, 0.0 }
 0x159   : > { %v343_v51 = vsel %vm342_vm4, %v339_v49, 0.0 }
 0x15a   : > { %v327_v48 = vadd.f32 %v325_v46, %v323_v47 }
 0x15c   : > { %v340_v50 = vsel %vm338_vm3, %v327_v48, 0.0 }
 0x15d   : > { %v344_v52 = vsel %vm342_vm4, %v340_v50, 0.0 }
 0x15e   : > { %v345_v53 = vadd.f32 %v344_v52, %v343_v51 }
 0x160   : > { %346 = vadd.xlane.f32.xlu0 %v345_v53 }
 0x1ed   : > { %v347_v54 = vpop.xlane.xlu0 %346 }
 0x1ee   : > { %v348_v55 = vrot.slane %v347_v54, 4 }
 0x1f0   : > { %v349_v56 = vadd.f32 %v348_v55, %v347_v54 }
 0x1f2   : > { %v350_v57 = vrot.slane %v349_v56, 2 }
 0x1f4   : > { %v351_v58 = vadd.f32 %v350_v57, %v349_v56 }
 0x1f6   : > { %v352_v59 = vrot.slane %v351_v58, 1 }
 0x1f8   : > { %v353_v60 = vadd.f32 %v352_v59, %v351_v58 }
 0x1fa   : > { %450 = vpush %v353_v60 }
 0x229   : > { %361 = sbr.rel (%p445_p7) target bundleno = 568 (0x238), region = 36 }
 0x22b   : > { %s451_s24 = spop %450 }
 0x22c   : > { %v355_v62 = vstv %s451_s24 }
 0x22d   : > { %v356_v63 = vadd.f32 %v355_v62, %v341_v61 }
 0x22f   : > { %357 = vst [vmem:[#allocation2] sm:$0xff] %v356_v63 }
 0x236   : > { %v362_v0 = vld [vmem:[#allocation2] sm:$0xff] }
 0x237   : > { %363 = vst [vmem:[#allocation3] sm:$0xff] %v362_v0 }
 0x238 PF: > { %p601_p8 = scmp.eq.s32.totalorder %s435_s12, 3  ;;  %s551_s26 = smov [#allocation3]  }
 0x239   : > { %s373_s27 = sshll.u32 %s551_s26, 4  ;;  %s374_s27 = int_to_ptr.vmem [resolvable:$true] %s373_s27 }
 0x23a   : > { %s495_s28 = scalar_lea.vmem %s374_s27, 128  ;;  %p502_p12 = scmp.lt.s32.totalorder %s374_s27, %s374_s27 }
 0x23b   : > { %p496_p9 = scmp.ne.s32.totalorder %s374_s27, %s495_s28  ;;  %p503_p13 = scmp.lt.s32.totalorder %s495_s28, %s495_s28 }
 0x23d   : > { %p497_p10 = pnand %p496_p9, %p601_p8  ;;  %p504_p0 = por %p503_p13, %p502_p12 }
 0x23f   : > { %p498_p11 = pneg %p497_p10 }
 0x241   : > { %p505_p1 = pnand %p504_p0, %p498_p11 }
 0x243   : > { %508 = shalt.err (!%p505_p1)
}
 0x244   : > { %s509_s3 = scalar_lea.hbm %s638_s2, 128 }
 0x245   : > { %p510_p2 = scmp.ne.s32.totalorder %s638_s2, %s509_s3  ;;  %p515_p5 = scmp.lt.u32.totalorder %s509_s3, %s638_s2 }
 0x247   : > { %p511_p3 = pnand %p510_p2, %p601_p8 }
 0x249   : > { %p512_p4 = pneg %p511_p3 }
 0x24b   : > { %p517_p6 = pnand %p515_p5, %p512_p4 }
 0x24d   : > { %520 = shalt.err (!%p517_p6)
}
 0x24e   : > { %453 = dma.vmem_to_hbm [thread:$0]  (%p601_p8), %s374_s27, 128, %s638_s2, [#allocation4]  }
 0x24f   : > { %534 = dma.done.wait (%p601_p8), [#allocation4], 128  }
 0x250   : > { %536 = vsyncadd (%p601_p8), [#allocation4], 4294967168 }
 0x251 PF: > { %s13_s11 = sadd.s32 1, %s547_s11   ;;  %s640_s9 = smov %s543_s10 }
 0x252   : > { %p10_p7 = scmp.ge.s32.totalorder %s13_s11, 6   ;;  %s641_s10 = smov %s643_s13 }
 0x254   :  { %12 = sbr.rel (!%p10_p7) target bundleno = 2 (0x2), region = 67 }
 0x25b   :  { %386 = vsyncpa [#allocation4], 1 }
 0x25c   :  { %388 = vsyncpa [#allocation4 + $0x1], 1 }

</bundles_post_ra>
